<compile_context>
chip_gen: v7x
topology: tpu7x:2x2x1
jax: 0.10.0
libtpu: 0.0.40
codegen_flags: <defaults>
</compile_context>

<pallas_src>
import functools
import math

import jax
import jax.numpy as jnp
import numpy as np
from jax.experimental import pallas as pl
from jax.experimental.pallas import tpu as pltpu


def _round_up(n, m):
    return -(-n // m) * m


# ----------------------------------------------------------------------------
# Pallas kernel: stacked tanh-RNN, static branch, attention gating, fused head.
# ----------------------------------------------------------------------------
def covid_rnn_kernel(ts_ref, st_ref, wA_ref, wB_ref, bias_ref, sc_ref, out_ref,
                     *, dims):
    (H, F_time, F_static,
     oWih0, oWhh0, oW1, oWs,
     oRa1, oSa1, oF1r, oF1s) = dims
    f32 = jnp.float32
    bf16 = jnp.bfloat16
    B = st_ref.shape[0]
    T = ts_ref.shape[0] // B
    Wb = wB_ref.shape[1]

    def mm(a, b):
        # MXU matmul: bf16 operands (weights pre-cast), f32 accumulation.
        return jnp.dot(a.astype(bf16), b, preferred_element_type=f32)

    # SMEM scalar biases
    ra2b = sc_ref[0]
    sa2b = sc_ref[1]
    f2b = sc_ref[2]

    # weight views: single hoisted loads from the two packed bf16 slabs
    wih0 = wA_ref[oWih0:oWih0 + F_time, :]
    whh0 = wA_ref[oWhh0:oWhh0 + H, :]
    w1 = wA_ref[oW1:oW1 + 2 * H, :]            # stacked [wih1; whh1]
    ws = wA_ref[oWs:oWs + F_static, :]

    ra1 = wB_ref[oRa1:oRa1 + H, :]
    sa1 = wB_ref[oSa1:oSa1 + H, :]
    f1r = wB_ref[oF1r:oF1r + H, :]
    f1s = wB_ref[oF1s:oF1s + H, :]

    # f32 bias rows (zero column padding stays zero through the whole network)
    b0 = bias_ref[0:1, :H]
    b1 = bias_ref[1:2, :H]
    bs = bias_ref[2:3, :H]
    ra1b = bias_ref[3:4, :Wb]
    ra2w = bias_ref[4:5, :Wb]
    sa1b = bias_ref[5:6, :Wb]
    sa2w = bias_ref[6:7, :Wb]
    f1b = bias_ref[7:8, :Wb]
    f2w = bias_ref[8:9, :Wb]

    # --- hoisted layer-0 input projection: one MXU matmul for all timesteps ---
    xproj0 = mm(ts_ref[...], wih0) + b0        # (T*B, H) f32

    # --- nn.RNN(tanh), 2 stacked layers, batch_first; h init zeros ---
    h0 = jnp.zeros((B, H), f32)
    h1 = jnp.zeros((B, H), f32)
    for t in range(T):  # T small & static: keep unrolled
        h0 = jnp.tanh(xproj0[t * B:(t + 1) * B, :] + mm(h0, whh0))
        # fused layer-1 step: single matmul over concat([h0_new, h1_prev])
        h1 = jnp.tanh(mm(jnp.concatenate([h0, h1], axis=-1), w1) + b1)
        # TODO(synk): inter-layer RNN dropout (p=0.2) is train-only; identity here.
    rnn_final = h1                             # rnn_out[:, -1, :]

    # --- static branch: Linear -> ReLU -> Dropout(0) (identity) ---
    static_out = jnp.maximum(mm(st_ref[...], ws) + bs, 0.0)

    # --- AttentionModule: N=1 matmuls done as VPU multiply + lane reduction ---
    rh = jnp.maximum(mm(rnn_final, ra1) + ra1b, 0.0)
    rnn_w = jax.nn.sigmoid(jnp.sum(rh * ra2w, axis=-1, keepdims=True) + ra2b)
    sh = jnp.maximum(mm(static_out, sa1) + sa1b, 0.0)
    static_w = jax.nn.sigmoid(jnp.sum(sh * sa2w, axis=-1, keepdims=True) + sa2b)
    inv_total = pl.reciprocal(rnn_w + static_w, approx=True)   # EUP path
    rnn_w = rnn_w * inv_total
    static_w = static_w * inv_total

    # --- head: split-weight fusion (no lane concat); BN folded into f1 ---
    z = mm(rnn_final * rnn_w, f1r) + mm(static_out * static_w, f1s) + f1b
    z = jnp.maximum(z, 0.0)
    # final Linear(f1 -> 1): VPU multiply + lane reduction instead of MXU
    out_ref[...] = jnp.sum(z * f2w, axis=-1, keepdims=True) + f2b


# ----------------------------------------------------------------------------
# One-time parameter folding & packing (bias pre-sum, BN fold, W1 stacking,
# bf16 cast, packing into 3 contiguous slabs).
# ----------------------------------------------------------------------------
def prepare_kernel_params(P):
    f32 = jnp.float32
    bf16 = jnp.bfloat16
    H = P["whh0"].shape[0]
    F_time = P["wih0"].shape[0]
    F_static = P["ws"].shape[0]
    H2 = P["ra1"].shape[1]
    F1 = P["f1"].shape[1]
    Wb = max(H2, F1)
    Wmax = max(H, Wb)

    # fold eval-mode BatchNorm1d (eps=1e-5) into the f1 weight / bias (f32)
    scale = P["bn_g"] * jax.lax.rsqrt(P["bn_v"] + 1e-5)        # (1, F1)
    f1_folded = P["f1"] * scale                                # (2H, F1)
    f1b_folded = (P["f1b"] - P["bn_m"]) * scale + P["bn_b"]    # (1, F1)

    b0 = P["bih0"] + P["bhh0"]
    b1 = P["bih1"] + P["bhh1"]
    w1 = jnp.concatenate([P["wih1"], P["whh1"]], axis=0)       # (2H, H)

    def pad_rows(x, rows):
        return jnp.pad(x, ((0, rows - x.shape[0]), (0, 0)))

    def pad_cols(x, cols):
        return jnp.pad(x, ((0, 0), (0, cols - x.shape[1])))

    # packed MXU weight slab A (lane width H, bf16); 16-row-aligned segments
    segA = [(P["wih0"], F_time), (P["whh0"], H), (w1, 2 * H), (P["ws"], F_static)]
    offsA, piecesA, rows = [], [], 0
    for mat, nrows in segA:
        offsA.append(rows)
        pad = _round_up(nrows, 16)
        piecesA.append(pad_rows(mat, pad))
        rows += pad
    wA = jnp.concatenate(piecesA, axis=0).astype(bf16)
    oWih0, oWhh0, oW1, oWs = offsA

    # packed MXU weight slab B (lane width Wb, bf16); zero column padding
    stride = _round_up(H, 16)
    segB = [P["ra1"], P["sa1"], f1_folded[:H], f1_folded[H:]]
    wB = jnp.concatenate(
        [pad_rows(pad_cols(m, Wb), stride) for m in segB], axis=0).astype(bf16)
    oRa1, oSa1, oF1r, oF1s = 0, stride, 2 * stride, 3 * stride

    # f32 bias slab (one row per bias / VPU-path weight, zero column padding)
    def row(x):
        return pad_cols(x, Wmax)

    bias = jnp.concatenate([
        row(b0), row(b1), row(P["bs"]),
        row(P["ra1b"]), row(P["ra2"].T),
        row(P["sa1b"]), row(P["sa2"].T),
        row(f1b_folded), row(P["f2"].T),
    ], axis=0).astype(f32)

    scalars = jnp.stack(
        [P["ra2b"][0, 0], P["sa2b"][0, 0], P["f2b"][0, 0]]).astype(f32)

    dims = (H, F_time, F_static, oWih0, oWhh0, oW1, oWs, oRa1, oSa1, oF1r, oF1s)
    return wA, wB, bias, scalars, dims


# ----------------------------------------------------------------------------
# Jitted per-call path: pad batch, go time-major & flatten, single pallas_call.
# ----------------------------------------------------------------------------
def _forward_impl(time_seq, static_feat, wA, wB, bias, scalars, dims):
    B, T, F_time = time_seq.shape
    B_pad = _round_up(B, 8)
    ts = time_seq.astype(jnp.float32)
    st = static_feat.astype(jnp.float32)
    if B_pad != B:
        ts = jnp.pad(ts, ((0, B_pad - B), (0, 0), (0, 0)))
        st = jnp.pad(st, ((0, B_pad - B), (0, 0)))
    # time-major + flattened in XLA (fuses with the transpose; the kernel never
    # reshapes, so no in-kernel VMEM relayout copy)
    ts_flat = jnp.transpose(ts, (1, 0, 2)).reshape(T * B_pad, F_time)

    vmem = pl.BlockSpec(memory_space=pltpu.MemorySpace.VMEM)
    smem = pl.BlockSpec(memory_space=pltpu.MemorySpace.SMEM)
    out = pl.pallas_call(
        functools.partial(covid_rnn_kernel, dims=dims),
        out_shape=jax.ShapeDtypeStruct((B_pad, 1), jnp.float32),
        in_specs=[vmem, vmem, vmem, vmem, vmem, smem],
        out_specs=vmem,
    )(ts_flat, st, wA, wB, bias, scalars)
    return out[:B, 0]                                  # .squeeze(1)


_forward_jit = jax.jit(_forward_impl, static_argnames=("dims",))


def make_covid19_rnn_forward(params):
    """Fold/pack parameters once at model load; return a jitted forward fn."""
    wA, wB, bias, scalars, dims = prepare_kernel_params(params)

    def forward(time_seq, static_feat):
        return _forward_jit(time_seq, static_feat, wA, wB, bias, scalars, dims=dims)

    return forward


# ----------------------------------------------------------------------------
# Deterministic parameter init (PyTorch-style U(-1/sqrt(fan_in), 1/sqrt(fan_in)))
# ----------------------------------------------------------------------------
def _uni(key, shape, bound):
    return jax.random.uniform(key, shape, jnp.float32, -bound, bound)


def init_params(key, time_f, static_f, H, f1_dim):
    keys = jax.random.split(key, 22)
    kH = 1.0 / math.sqrt(H)
    ks = 1.0 / math.sqrt(static_f)
    ka1 = 1.0 / math.sqrt(H)
    ka2 = 1.0 / math.sqrt(H // 2)
    kf1 = 1.0 / math.sqrt(2 * H)
    kf2 = 1.0 / math.sqrt(f1_dim)
    return {
        "wih0": _uni(keys[0], (time_f, H), kH),
        "whh0": _uni(keys[1], (H, H), kH),
        "bih0": _uni(keys[2], (1, H), kH),
        "bhh0": _uni(keys[3], (1, H), kH),
        "wih1": _uni(keys[4], (H, H), kH),
        "whh1": _uni(keys[5], (H, H), kH),
        "bih1": _uni(keys[6], (1, H), kH),
        "bhh1": _uni(keys[7], (1, H), kH),
        "ws": _uni(keys[8], (static_f, H), ks),
        "bs": _uni(keys[9], (1, H), ks),
        "ra1": _uni(keys[10], (H, H // 2), ka1),
        "ra1b": _uni(keys[11], (1, H // 2), ka1),
        "ra2": _uni(keys[12], (H // 2, 1), ka2),
        "ra2b": _uni(keys[13], (1, 1), ka2),
        "sa1": _uni(keys[14], (H, H // 2), ka1),
        "sa1b": _uni(keys[15], (1, H // 2), ka1),
        "sa2": _uni(keys[16], (H // 2, 1), ka2),
        "sa2b": _uni(keys[17], (1, 1), ka2),
        "f1": _uni(keys[18], (2 * H, f1_dim), kf1),
        "f1b": _uni(keys[19], (1, f1_dim), kf1),
        "bn_g": jnp.ones((1, f1_dim), jnp.float32),
        "bn_b": jnp.zeros((1, f1_dim), jnp.float32),
        "bn_m": jnp.zeros((1, f1_dim), jnp.float32),
        "bn_v": jnp.ones((1, f1_dim), jnp.float32),
        "f2": _uni(keys[20], (f1_dim, 1), kf2),
        "f2b": _uni(keys[21], (1, 1), kf2),
    }


# ----------------------------------------------------------------------------
# Pure-JAX f32 reference of the same forward pass (un-folded params).
# ----------------------------------------------------------------------------
def reference_forward(time_seq, static_feat, P):
    B, T, _ = time_seq.shape
    H = P["whh0"].shape[0]
    h0 = jnp.zeros((B, H), jnp.float32)
    h1 = jnp.zeros((B, H), jnp.float32)
    for t in range(T):
        x = time_seq[:, t, :]
        h0 = jnp.tanh(x @ P["wih0"] + P["bih0"] + h0 @ P["whh0"] + P["bhh0"])
        h1 = jnp.tanh(h0 @ P["wih1"] + P["bih1"] + h1 @ P["whh1"] + P["bhh1"])
    static_out = jax.nn.relu(static_feat @ P["ws"] + P["bs"])
    rw = jax.nn.sigmoid(jax.nn.relu(h1 @ P["ra1"] + P["ra1b"]) @ P["ra2"] + P["ra2b"])
    sw = jax.nn.sigmoid(jax.nn.relu(static_out @ P["sa1"] + P["sa1b"]) @ P["sa2"] + P["sa2b"])
    tot = rw + sw
    combined = jnp.concatenate([h1 * (rw / tot), static_out * (sw / tot)], axis=1)
    z = combined @ P["f1"] + P["f1b"]
    z = (z - P["bn_m"]) / jnp.sqrt(P["bn_v"] + 1e-5) * P["bn_g"] + P["bn_b"]
    z = jax.nn.relu(z)
    out = z @ P["f2"] + P["f2b"]
    return out[:, 0]


if __name__ == "__main__":
    B, T = 4, 8                 # batch, sequence length
    TIME_F, STATIC_F = 5, 7     # time-series features, static features
    H, F1_DIM = 32, 16          # rnn_hidden_dim, final_layers_1_dim

    key = jax.random.PRNGKey(0)
    k_ts, k_st, k_param = jax.random.split(key, 3)
    time_seq = jax.random.uniform(k_ts, (B, T, TIME_F), jnp.float32)
    static_feat = jax.random.uniform(k_st, (B, STATIC_F), jnp.float32)
    params = init_params(k_param, TIME_F, STATIC_F, H, F1_DIM)

    forward = make_covid19_rnn_forward(params)   # folds/packs params once
    out = jax.block_until_ready(forward(time_seq, static_feat))
    assert out.shape == (B,)

    ref = reference_forward(time_seq, static_feat, params)
    # bf16 MXU operands + approx reciprocal -> validate with a modest tolerance
    np.testing.assert_allclose(np.asarray(out), np.asarray(ref), rtol=2e-2, atol=2e-2)
    print("KERNEL_OK")
</pallas_src>

<mosaic_0001>
module attributes {stable_mosaic.version = 11 : i64} {
  func.func @covid_rnn_kernel(%arg0: memref<64x5xf32, #tpu.memory_space<vmem>>, %arg1: memref<8x7xf32, #tpu.memory_space<vmem>>, %arg2: memref<128x32xbf16, #tpu.memory_space<vmem>>, %arg3: memref<128x16xbf16, #tpu.memory_space<vmem>>, %arg4: memref<9x32xf32, #tpu.memory_space<vmem>>, %arg5: memref<3xf32, #tpu.memory_space<smem>>, %arg6: memref<8x1xf32, #tpu.memory_space<vmem>>) attributes {dimension_semantics = [], scalar_prefetch = 0 : i64, scratch_operands = 0 : i64, tpu.core_type = #tpu.core_type<tc>} {
    %c0 = arith.constant 0 : index
    %0 = memref.load %arg5[%c0] : memref<3xf32, #tpu.memory_space<smem>>
    %c1 = arith.constant 1 : index
    %1 = memref.load %arg5[%c1] : memref<3xf32, #tpu.memory_space<smem>>
    %c2 = arith.constant 2 : index
    %2 = memref.load %arg5[%c2] : memref<3xf32, #tpu.memory_space<smem>>
    %c0_0 = arith.constant 0 : index
    %c0_1 = arith.constant 0 : index
    %3 = vector.load %arg2[%c0_0, %c0_1] : memref<128x32xbf16, #tpu.memory_space<vmem>>, vector<5x32xbf16>
    %c16 = arith.constant 16 : index
    %c0_2 = arith.constant 0 : index
    %4 = vector.load %arg2[%c16, %c0_2] : memref<128x32xbf16, #tpu.memory_space<vmem>>, vector<32x32xbf16>
    %c48 = arith.constant 48 : index
    %c0_3 = arith.constant 0 : index
    %5 = vector.load %arg2[%c48, %c0_3] : memref<128x32xbf16, #tpu.memory_space<vmem>>, vector<64x32xbf16>
    %c112 = arith.constant 112 : index
    %c0_4 = arith.constant 0 : index
    %6 = vector.load %arg2[%c112, %c0_4] : memref<128x32xbf16, #tpu.memory_space<vmem>>, vector<7x32xbf16>
    %c0_5 = arith.constant 0 : index
    %c0_6 = arith.constant 0 : index
    %7 = vector.load %arg3[%c0_5, %c0_6] : memref<128x16xbf16, #tpu.memory_space<vmem>>, vector<32x16xbf16>
    %c32 = arith.constant 32 : index
    %c0_7 = arith.constant 0 : index
    %8 = vector.load %arg3[%c32, %c0_7] : memref<128x16xbf16, #tpu.memory_space<vmem>>, vector<32x16xbf16>
    %c64 = arith.constant 64 : index
    %c0_8 = arith.constant 0 : index
    %9 = vector.load %arg3[%c64, %c0_8] : memref<128x16xbf16, #tpu.memory_space<vmem>>, vector<32x16xbf16>
    %c96 = arith.constant 96 : index
    %c0_9 = arith.constant 0 : index
    %10 = vector.load %arg3[%c96, %c0_9] : memref<128x16xbf16, #tpu.memory_space<vmem>>, vector<32x16xbf16>
    %c0_10 = arith.constant 0 : index
    %c0_11 = arith.constant 0 : index
    %11 = vector.load %arg4[%c0_10, %c0_11] : memref<9x32xf32, #tpu.memory_space<vmem>>, vector<1x32xf32>
    %c1_12 = arith.constant 1 : index
    %c0_13 = arith.constant 0 : index
    %12 = vector.load %arg4[%c1_12, %c0_13] : memref<9x32xf32, #tpu.memory_space<vmem>>, vector<1x32xf32>
    %c2_14 = arith.constant 2 : index
    %c0_15 = arith.constant 0 : index
    %13 = vector.load %arg4[%c2_14, %c0_15] : memref<9x32xf32, #tpu.memory_space<vmem>>, vector<1x32xf32>
    %c3 = arith.constant 3 : index
    %c0_16 = arith.constant 0 : index
    %14 = vector.load %arg4[%c3, %c0_16] : memref<9x32xf32, #tpu.memory_space<vmem>>, vector<1x16xf32>
    %c4 = arith.constant 4 : index
    %c0_17 = arith.constant 0 : index
    %15 = vector.load %arg4[%c4, %c0_17] : memref<9x32xf32, #tpu.memory_space<vmem>>, vector<1x16xf32>
    %c5 = arith.constant 5 : index
    %c0_18 = arith.constant 0 : index
    %16 = vector.load %arg4[%c5, %c0_18] : memref<9x32xf32, #tpu.memory_space<vmem>>, vector<1x16xf32>
    %c6 = arith.constant 6 : index
    %c0_19 = arith.constant 0 : index
    %17 = vector.load %arg4[%c6, %c0_19] : memref<9x32xf32, #tpu.memory_space<vmem>>, vector<1x16xf32>
    %c7 = arith.constant 7 : index
    %c0_20 = arith.constant 0 : index
    %18 = vector.load %arg4[%c7, %c0_20] : memref<9x32xf32, #tpu.memory_space<vmem>>, vector<1x16xf32>
    %c8 = arith.constant 8 : index
    %c0_21 = arith.constant 0 : index
    %19 = vector.load %arg4[%c8, %c0_21] : memref<9x32xf32, #tpu.memory_space<vmem>>, vector<1x16xf32>
    %c0_22 = arith.constant 0 : index
    %c0_23 = arith.constant 0 : index
    %20 = vector.load %arg0[%c0_22, %c0_23] : memref<64x5xf32, #tpu.memory_space<vmem>>, vector<64x5xf32>
    %21 = arith.truncf %20 : vector<64x5xf32> to vector<64x5xbf16>
    %cst = arith.constant dense<0.000000e+00> : vector<64x32xf32>
    %22 = tpu.matmul %21, %3, %cst {dimension_numbers = #tpu.dot_dimension_numbers<[1], [0], [0], [1], [0, 0, 1, 1], [], []>} : vector<64x5xbf16>, vector<5x32xbf16>, vector<64x32xf32> -> vector<64x32xf32>
    %23 = vector.broadcast %11 : vector<1x32xf32> to vector<64x32xf32>
    %24 = arith.addf %22, %23 : vector<64x32xf32>
    %cst_24 = arith.constant 0.000000e+00 : f32
    %25 = vector.broadcast %cst_24 : f32 to vector<8x32xf32>
    %cst_25 = arith.constant 0.000000e+00 : f32
    %26 = vector.broadcast %cst_25 : f32 to vector<8x32xf32>
    %27 = vector.extract_strided_slice %24 {offsets = [0, 0], sizes = [8, 32], strides = [1, 1]} : vector<64x32xf32> to vector<8x32xf32>
    %28 = arith.truncf %25 : vector<8x32xf32> to vector<8x32xbf16>
    %cst_26 = arith.constant dense<0.000000e+00> : vector<8x32xf32>
    %29 = tpu.matmul %28, %4, %cst_26 {dimension_numbers = #tpu.dot_dimension_numbers<[1], [0], [0], [1], [0, 0, 1, 1], [], []>} : vector<8x32xbf16>, vector<32x32xbf16>, vector<8x32xf32> -> vector<8x32xf32>
    %30 = arith.addf %27, %29 : vector<8x32xf32>
    %31 = math.tanh %30 : vector<8x32xf32>
    %32 = tpu.concatenate %31, %26 in 1 : vector<8x32xf32>, vector<8x32xf32> -> vector<8x64xf32>
    %33 = arith.truncf %32 : vector<8x64xf32> to vector<8x64xbf16>
    %cst_27 = arith.constant dense<0.000000e+00> : vector<8x32xf32>
    %34 = tpu.matmul %33, %5, %cst_27 {dimension_numbers = #tpu.dot_dimension_numbers<[1], [0], [0], [1], [0, 0, 1, 1], [], []>} : vector<8x64xbf16>, vector<64x32xbf16>, vector<8x32xf32> -> vector<8x32xf32>
    %35 = vector.broadcast %12 : vector<1x32xf32> to vector<8x32xf32>
    %36 = arith.addf %34, %35 : vector<8x32xf32>
    %37 = math.tanh %36 : vector<8x32xf32>
    %38 = vector.extract_strided_slice %24 {offsets = [8, 0], sizes = [8, 32], strides = [1, 1]} : vector<64x32xf32> to vector<8x32xf32>
    %39 = arith.truncf %31 : vector<8x32xf32> to vector<8x32xbf16>
    %cst_28 = arith.constant dense<0.000000e+00> : vector<8x32xf32>
    %40 = tpu.matmul %39, %4, %cst_28 {dimension_numbers = #tpu.dot_dimension_numbers<[1], [0], [0], [1], [0, 0, 1, 1], [], []>} : vector<8x32xbf16>, vector<32x32xbf16>, vector<8x32xf32> -> vector<8x32xf32>
    %41 = arith.addf %38, %40 : vector<8x32xf32>
    %42 = math.tanh %41 : vector<8x32xf32>
    %43 = tpu.concatenate %42, %37 in 1 : vector<8x32xf32>, vector<8x32xf32> -> vector<8x64xf32>
    %44 = arith.truncf %43 : vector<8x64xf32> to vector<8x64xbf16>
    %cst_29 = arith.constant dense<0.000000e+00> : vector<8x32xf32>
    %45 = tpu.matmul %44, %5, %cst_29 {dimension_numbers = #tpu.dot_dimension_numbers<[1], [0], [0], [1], [0, 0, 1, 1], [], []>} : vector<8x64xbf16>, vector<64x32xbf16>, vector<8x32xf32> -> vector<8x32xf32>
    %46 = vector.broadcast %12 : vector<1x32xf32> to vector<8x32xf32>
    %47 = arith.addf %45, %46 : vector<8x32xf32>
    %48 = math.tanh %47 : vector<8x32xf32>
    %49 = vector.extract_strided_slice %24 {offsets = [16, 0], sizes = [8, 32], strides = [1, 1]} : vector<64x32xf32> to vector<8x32xf32>
    %50 = arith.truncf %42 : vector<8x32xf32> to vector<8x32xbf16>
    %cst_30 = arith.constant dense<0.000000e+00> : vector<8x32xf32>
    %51 = tpu.matmul %50, %4, %cst_30 {dimension_numbers = #tpu.dot_dimension_numbers<[1], [0], [0], [1], [0, 0, 1, 1], [], []>} : vector<8x32xbf16>, vector<32x32xbf16>, vector<8x32xf32> -> vector<8x32xf32>
    %52 = arith.addf %49, %51 : vector<8x32xf32>
    %53 = math.tanh %52 : vector<8x32xf32>
    %54 = tpu.concatenate %53, %48 in 1 : vector<8x32xf32>, vector<8x32xf32> -> vector<8x64xf32>
    %55 = arith.truncf %54 : vector<8x64xf32> to vector<8x64xbf16>
    %cst_31 = arith.constant dense<0.000000e+00> : vector<8x32xf32>
    %56 = tpu.matmul %55, %5, %cst_31 {dimension_numbers = #tpu.dot_dimension_numbers<[1], [0], [0], [1], [0, 0, 1, 1], [], []>} : vector<8x64xbf16>, vector<64x32xbf16>, vector<8x32xf32> -> vector<8x32xf32>
    %57 = vector.broadcast %12 : vector<1x32xf32> to vector<8x32xf32>
    %58 = arith.addf %56, %57 : vector<8x32xf32>
    %59 = math.tanh %58 : vector<8x32xf32>
    %60 = vector.extract_strided_slice %24 {offsets = [24, 0], sizes = [8, 32], strides = [1, 1]} : vector<64x32xf32> to vector<8x32xf32>
    %61 = arith.truncf %53 : vector<8x32xf32> to vector<8x32xbf16>
    %cst_32 = arith.constant dense<0.000000e+00> : vector<8x32xf32>
    %62 = tpu.matmul %61, %4, %cst_32 {dimension_numbers = #tpu.dot_dimension_numbers<[1], [0], [0], [1], [0, 0, 1, 1], [], []>} : vector<8x32xbf16>, vector<32x32xbf16>, vector<8x32xf32> -> vector<8x32xf32>
    %63 = arith.addf %60, %62 : vector<8x32xf32>
    %64 = math.tanh %63 : vector<8x32xf32>
    %65 = tpu.concatenate %64, %59 in 1 : vector<8x32xf32>, vector<8x32xf32> -> vector<8x64xf32>
    %66 = arith.truncf %65 : vector<8x64xf32> to vector<8x64xbf16>
    %cst_33 = arith.constant dense<0.000000e+00> : vector<8x32xf32>
    %67 = tpu.matmul %66, %5, %cst_33 {dimension_numbers = #tpu.dot_dimension_numbers<[1], [0], [0], [1], [0, 0, 1, 1], [], []>} : vector<8x64xbf16>, vector<64x32xbf16>, vector<8x32xf32> -> vector<8x32xf32>
    %68 = vector.broadcast %12 : vector<1x32xf32> to vector<8x32xf32>
    %69 = arith.addf %67, %68 : vector<8x32xf32>
    %70 = math.tanh %69 : vector<8x32xf32>
    %71 = vector.extract_strided_slice %24 {offsets = [32, 0], sizes = [8, 32], strides = [1, 1]} : vector<64x32xf32> to vector<8x32xf32>
    %72 = arith.truncf %64 : vector<8x32xf32> to vector<8x32xbf16>
    %cst_34 = arith.constant dense<0.000000e+00> : vector<8x32xf32>
    %73 = tpu.matmul %72, %4, %cst_34 {dimension_numbers = #tpu.dot_dimension_numbers<[1], [0], [0], [1], [0, 0, 1, 1], [], []>} : vector<8x32xbf16>, vector<32x32xbf16>, vector<8x32xf32> -> vector<8x32xf32>
    %74 = arith.addf %71, %73 : vector<8x32xf32>
    %75 = math.tanh %74 : vector<8x32xf32>
    %76 = tpu.concatenate %75, %70 in 1 : vector<8x32xf32>, vector<8x32xf32> -> vector<8x64xf32>
    %77 = arith.truncf %76 : vector<8x64xf32> to vector<8x64xbf16>
    %cst_35 = arith.constant dense<0.000000e+00> : vector<8x32xf32>
    %78 = tpu.matmul %77, %5, %cst_35 {dimension_numbers = #tpu.dot_dimension_numbers<[1], [0], [0], [1], [0, 0, 1, 1], [], []>} : vector<8x64xbf16>, vector<64x32xbf16>, vector<8x32xf32> -> vector<8x32xf32>
    %79 = vector.broadcast %12 : vector<1x32xf32> to vector<8x32xf32>
    %80 = arith.addf %78, %79 : vector<8x32xf32>
    %81 = math.tanh %80 : vector<8x32xf32>
    %82 = vector.extract_strided_slice %24 {offsets = [40, 0], sizes = [8, 32], strides = [1, 1]} : vector<64x32xf32> to vector<8x32xf32>
    %83 = arith.truncf %75 : vector<8x32xf32> to vector<8x32xbf16>
    %cst_36 = arith.constant dense<0.000000e+00> : vector<8x32xf32>
    %84 = tpu.matmul %83, %4, %cst_36 {dimension_numbers = #tpu.dot_dimension_numbers<[1], [0], [0], [1], [0, 0, 1, 1], [], []>} : vector<8x32xbf16>, vector<32x32xbf16>, vector<8x32xf32> -> vector<8x32xf32>
    %85 = arith.addf %82, %84 : vector<8x32xf32>
    %86 = math.tanh %85 : vector<8x32xf32>
    %87 = tpu.concatenate %86, %81 in 1 : vector<8x32xf32>, vector<8x32xf32> -> vector<8x64xf32>
    %88 = arith.truncf %87 : vector<8x64xf32> to vector<8x64xbf16>
    %cst_37 = arith.constant dense<0.000000e+00> : vector<8x32xf32>
    %89 = tpu.matmul %88, %5, %cst_37 {dimension_numbers = #tpu.dot_dimension_numbers<[1], [0], [0], [1], [0, 0, 1, 1], [], []>} : vector<8x64xbf16>, vector<64x32xbf16>, vector<8x32xf32> -> vector<8x32xf32>
    %90 = vector.broadcast %12 : vector<1x32xf32> to vector<8x32xf32>
    %91 = arith.addf %89, %90 : vector<8x32xf32>
    %92 = math.tanh %91 : vector<8x32xf32>
    %93 = vector.extract_strided_slice %24 {offsets = [48, 0], sizes = [8, 32], strides = [1, 1]} : vector<64x32xf32> to vector<8x32xf32>
    %94 = arith.truncf %86 : vector<8x32xf32> to vector<8x32xbf16>
    %cst_38 = arith.constant dense<0.000000e+00> : vector<8x32xf32>
    %95 = tpu.matmul %94, %4, %cst_38 {dimension_numbers = #tpu.dot_dimension_numbers<[1], [0], [0], [1], [0, 0, 1, 1], [], []>} : vector<8x32xbf16>, vector<32x32xbf16>, vector<8x32xf32> -> vector<8x32xf32>
    %96 = arith.addf %93, %95 : vector<8x32xf32>
    %97 = math.tanh %96 : vector<8x32xf32>
    %98 = tpu.concatenate %97, %92 in 1 : vector<8x32xf32>, vector<8x32xf32> -> vector<8x64xf32>
    %99 = arith.truncf %98 : vector<8x64xf32> to vector<8x64xbf16>
    %cst_39 = arith.constant dense<0.000000e+00> : vector<8x32xf32>
    %100 = tpu.matmul %99, %5, %cst_39 {dimension_numbers = #tpu.dot_dimension_numbers<[1], [0], [0], [1], [0, 0, 1, 1], [], []>} : vector<8x64xbf16>, vector<64x32xbf16>, vector<8x32xf32> -> vector<8x32xf32>
    %101 = vector.broadcast %12 : vector<1x32xf32> to vector<8x32xf32>
    %102 = arith.addf %100, %101 : vector<8x32xf32>
    %103 = math.tanh %102 : vector<8x32xf32>
    %104 = vector.extract_strided_slice %24 {offsets = [56, 0], sizes = [8, 32], strides = [1, 1]} : vector<64x32xf32> to vector<8x32xf32>
    %105 = arith.truncf %97 : vector<8x32xf32> to vector<8x32xbf16>
    %cst_40 = arith.constant dense<0.000000e+00> : vector<8x32xf32>
    %106 = tpu.matmul %105, %4, %cst_40 {dimension_numbers = #tpu.dot_dimension_numbers<[1], [0], [0], [1], [0, 0, 1, 1], [], []>} : vector<8x32xbf16>, vector<32x32xbf16>, vector<8x32xf32> -> vector<8x32xf32>
    %107 = arith.addf %104, %106 : vector<8x32xf32>
    %108 = math.tanh %107 : vector<8x32xf32>
    %109 = tpu.concatenate %108, %103 in 1 : vector<8x32xf32>, vector<8x32xf32> -> vector<8x64xf32>
    %110 = arith.truncf %109 : vector<8x64xf32> to vector<8x64xbf16>
    %cst_41 = arith.constant dense<0.000000e+00> : vector<8x32xf32>
    %111 = tpu.matmul %110, %5, %cst_41 {dimension_numbers = #tpu.dot_dimension_numbers<[1], [0], [0], [1], [0, 0, 1, 1], [], []>} : vector<8x64xbf16>, vector<64x32xbf16>, vector<8x32xf32> -> vector<8x32xf32>
    %112 = vector.broadcast %12 : vector<1x32xf32> to vector<8x32xf32>
    %113 = arith.addf %111, %112 : vector<8x32xf32>
    %114 = math.tanh %113 : vector<8x32xf32>
    %c0_42 = arith.constant 0 : index
    %c0_43 = arith.constant 0 : index
    %115 = vector.load %arg1[%c0_42, %c0_43] : memref<8x7xf32, #tpu.memory_space<vmem>>, vector<8x7xf32>
    %116 = arith.truncf %115 : vector<8x7xf32> to vector<8x7xbf16>
    %cst_44 = arith.constant dense<0.000000e+00> : vector<8x32xf32>
    %117 = tpu.matmul %116, %6, %cst_44 {dimension_numbers = #tpu.dot_dimension_numbers<[1], [0], [0], [1], [0, 0, 1, 1], [], []>} : vector<8x7xbf16>, vector<7x32xbf16>, vector<8x32xf32> -> vector<8x32xf32>
    %118 = vector.broadcast %13 : vector<1x32xf32> to vector<8x32xf32>
    %119 = arith.addf %117, %118 : vector<8x32xf32>
    %cst_45 = arith.constant 0.000000e+00 : f32
    %120 = vector.broadcast %cst_45 : f32 to vector<8x32xf32>
    %121 = arith.maximumf %119, %120 : vector<8x32xf32>
    %122 = arith.truncf %114 : vector<8x32xf32> to vector<8x32xbf16>
    %cst_46 = arith.constant dense<0.000000e+00> : vector<8x16xf32>
    %123 = tpu.matmul %122, %7, %cst_46 {dimension_numbers = #tpu.dot_dimension_numbers<[1], [0], [0], [1], [0, 0, 1, 1], [], []>} : vector<8x32xbf16>, vector<32x16xbf16>, vector<8x16xf32> -> vector<8x16xf32>
    %124 = vector.broadcast %14 : vector<1x16xf32> to vector<8x16xf32>
    %125 = arith.addf %123, %124 : vector<8x16xf32>
    %cst_47 = arith.constant 0.000000e+00 : f32
    %126 = vector.broadcast %cst_47 : f32 to vector<8x16xf32>
    %127 = arith.maximumf %125, %126 : vector<8x16xf32>
    %128 = vector.broadcast %15 : vector<1x16xf32> to vector<8x16xf32>
    %129 = arith.mulf %127, %128 : vector<8x16xf32>
    %cst_48 = arith.constant dense<0.000000e+00> : vector<8xf32>
    %130 = vector.multi_reduction <add>, %129, %cst_48 [1] : vector<8x16xf32> to vector<8xf32>
    %131 = vector.shape_cast %130 : vector<8xf32> to vector<8x1xf32>
    %132 = vector.broadcast %0 : f32 to vector<8x1xf32>
    %133 = arith.addf %131, %132 : vector<8x1xf32>
    %134 = arith.negf %133 : vector<8x1xf32>
    %135 = math.exp %134 : vector<8x1xf32>
    %cst_49 = arith.constant 1.000000e+00 : f32
    %136 = vector.broadcast %cst_49 : f32 to vector<8x1xf32>
    %137 = arith.addf %136, %135 : vector<8x1xf32>
    %138 = arith.divf %136, %137 : vector<8x1xf32>
    %139 = arith.truncf %121 : vector<8x32xf32> to vector<8x32xbf16>
    %cst_50 = arith.constant dense<0.000000e+00> : vector<8x16xf32>
    %140 = tpu.matmul %139, %8, %cst_50 {dimension_numbers = #tpu.dot_dimension_numbers<[1], [0], [0], [1], [0, 0, 1, 1], [], []>} : vector<8x32xbf16>, vector<32x16xbf16>, vector<8x16xf32> -> vector<8x16xf32>
    %141 = vector.broadcast %16 : vector<1x16xf32> to vector<8x16xf32>
    %142 = arith.addf %140, %141 : vector<8x16xf32>
    %cst_51 = arith.constant 0.000000e+00 : f32
    %143 = vector.broadcast %cst_51 : f32 to vector<8x16xf32>
    %144 = arith.maximumf %142, %143 : vector<8x16xf32>
    %145 = vector.broadcast %17 : vector<1x16xf32> to vector<8x16xf32>
    %146 = arith.mulf %144, %145 : vector<8x16xf32>
    %cst_52 = arith.constant dense<0.000000e+00> : vector<8xf32>
    %147 = vector.multi_reduction <add>, %146, %cst_52 [1] : vector<8x16xf32> to vector<8xf32>
    %148 = vector.shape_cast %147 : vector<8xf32> to vector<8x1xf32>
    %149 = vector.broadcast %1 : f32 to vector<8x1xf32>
    %150 = arith.addf %148, %149 : vector<8x1xf32>
    %151 = arith.negf %150 : vector<8x1xf32>
    %152 = math.exp %151 : vector<8x1xf32>
    %cst_53 = arith.constant 1.000000e+00 : f32
    %153 = vector.broadcast %cst_53 : f32 to vector<8x1xf32>
    %154 = arith.addf %153, %152 : vector<8x1xf32>
    %155 = arith.divf %153, %154 : vector<8x1xf32>
    %156 = arith.addf %138, %155 : vector<8x1xf32>
    %157 = tpu.reciprocal %156 {approx = true} : vector<8x1xf32> -> vector<8x1xf32>
    %158 = arith.mulf %138, %157 : vector<8x1xf32>
    %159 = arith.mulf %155, %157 : vector<8x1xf32>
    %160 = vector.broadcast %158 : vector<8x1xf32> to vector<8x32xf32>
    %161 = arith.mulf %114, %160 : vector<8x32xf32>
    %162 = arith.truncf %161 : vector<8x32xf32> to vector<8x32xbf16>
    %cst_54 = arith.constant dense<0.000000e+00> : vector<8x16xf32>
    %163 = tpu.matmul %162, %9, %cst_54 {dimension_numbers = #tpu.dot_dimension_numbers<[1], [0], [0], [1], [0, 0, 1, 1], [], []>} : vector<8x32xbf16>, vector<32x16xbf16>, vector<8x16xf32> -> vector<8x16xf32>
    %164 = vector.broadcast %159 : vector<8x1xf32> to vector<8x32xf32>
    %165 = arith.mulf %121, %164 : vector<8x32xf32>
    %166 = arith.truncf %165 : vector<8x32xf32> to vector<8x32xbf16>
    %cst_55 = arith.constant dense<0.000000e+00> : vector<8x16xf32>
    %167 = tpu.matmul %166, %10, %cst_55 {dimension_numbers = #tpu.dot_dimension_numbers<[1], [0], [0], [1], [0, 0, 1, 1], [], []>} : vector<8x32xbf16>, vector<32x16xbf16>, vector<8x16xf32> -> vector<8x16xf32>
    %168 = arith.addf %163, %167 : vector<8x16xf32>
    %169 = vector.broadcast %18 : vector<1x16xf32> to vector<8x16xf32>
    %170 = arith.addf %168, %169 : vector<8x16xf32>
    %cst_56 = arith.constant 0.000000e+00 : f32
    %171 = vector.broadcast %cst_56 : f32 to vector<8x16xf32>
    %172 = arith.maximumf %170, %171 : vector<8x16xf32>
    %173 = vector.broadcast %19 : vector<1x16xf32> to vector<8x16xf32>
    %174 = arith.mulf %172, %173 : vector<8x16xf32>
    %cst_57 = arith.constant dense<0.000000e+00> : vector<8xf32>
    %175 = vector.multi_reduction <add>, %174, %cst_57 [1] : vector<8x16xf32> to vector<8xf32>
    %176 = vector.shape_cast %175 : vector<8xf32> to vector<8x1xf32>
    %177 = vector.broadcast %2 : f32 to vector<8x1xf32>
    %178 = arith.addf %176, %177 : vector<8x1xf32>
    %c0_58 = arith.constant 0 : index
    %c0_59 = arith.constant 0 : index
    %179 = vector.load %arg6[%c0_58, %c0_59] : memref<8x1xf32, #tpu.memory_space<vmem>>, vector<8x1xf32>
    tpu.vector_store %arg6[%c0_58, %c0_59], %178 {strides = array<i32>} : memref<8x1xf32, #tpu.memory_space<vmem>>, vector<8x1xf32>,
    return
  }
}

</mosaic_0001>

<bundles_post_ra>
// kernel: _forward_impl.1
= control target key start
LH: loop header
LB: loop body
LE: loop exit
PB: predicated region body
PF: predicated region fallthrough
CT: control target
= control target key end

     0   :  { %11 = vsyncpa [#allocation3], 0  ;;  %s2156_s0 = inlined_call_operand.vmem [shape: f32[64,5], index: 0, kind: input, shape index: {}]   ;;  %s2157_s1 = inlined_call_operand.vmem [shape: f32[8,7], index: 1, kind: input, shape index: {}]   ;;  %s2158_s2 = inlined_call_operand.vmem [shape: bf16[128,32], index: 2, kind: input, shape index: {}]   ;;  %s2159_s3 = inlined_call_operand.vmem [shape: bf16[128,16], index: 3, kind: input, shape index: {}]   ;;  %s2160_s4 = inlined_call_operand.vmem [shape: f32[9,32], index: 4, kind: input, shape index: {}]   ;;  %s2161_s5 = inlined_call_operand.vmem [shape: f32[3], index: 5, kind: input, shape index: {}]   ;;  %s2162_s6 = inlined_call_operand.vmem [shape: f32[8,1], index: 6, kind: output, shape index: {}]  }
   0x1   :  { %s28_s23 = sshll.u32 %s2161_s5, 4  ;;  %s29_s23 = int_to_ptr.vmem [resolvable:$true] %s28_s23 }
   0x2   :  { %s1742_s24 = scalar_lea.vmem %s29_s23, 16  ;;  %p1747_p1 = scmp.lt.s32.totalorder %s29_s23, %s29_s23 }
   0x3   :  { %p1743_p0 = scmp.ne.s32.totalorder %s29_s23, %s1742_s24  ;;  %p1748_p2 = scmp.lt.s32.totalorder %s1742_s24, %s1742_s24 }
   0x5   :  { %p1749_p3 = por %p1748_p2, %p1747_p1 }
   0x7   :  { %p1750_p4 = pnand %p1749_p3, %p1743_p0 }
   0x9   :  { %1753 = shalt.err (!%p1750_p4)
}
   0xa   :  { %s1756_s25 = smov [#allocation2]  }
   0xb   :  { %31 = dma.vmem_to_smem %s29_s23, 16, %s1756_s25, [#allocation3]  }
   0xc   :  { %1754 = dma.done.wait [#allocation3], 16  }
   0xd   :  { %1755 = vsyncadd [#allocation3], 4294967280 }
   0xe   :  { %35 = sfence }
   0xf   :  { %v1803_v0 = vld [vmem:[%s2158_s2 + $0x8] sm:$0xff]   ;;  %v1757_v1 = vmov 0.0   ;;  %v40_v2 = vld [vmem:[%s2158_s2] sm:$0x7]  ;;  %vm108_vm0 = vcmask 1041408   ;;  %vm109_vm1 = vcmask 1042432  }
  0x10   :  { %1482 = vmatprep.subr.bf16.mxu1 %v1757_v1  ;;  %v1758_v3 = vmov 65535   ;;  %v1816_v6 = vld [vmem:[%s2158_s2 + $0x10] sm:$0xff]   ;;  %v79_v7 = vld [vmem:[%s2156_s0] sm:$0xff]  ;;  %v80_v8 = vld [vmem:[%s2156_s0 + $0x8] sm:$0xff]  ;;  %vm95_vm2 = vcmask 39936   ;;  %vm1759_vm3 = vmmov 0  }
  0x11   :  { %1483 = vmatpush3.bf16.msra.mxu1 %v1803_v0  ;;  %v110_v4 = vsel %vm108_vm0, 4294967295, %v1758_v3  ;;  %v1810_v5 = vsel %vm109_vm1, 4294967295, %v1758_v3  ;;  %v87_v10 = vpack.c.bf16 %v80_v8, %v79_v7  ;;  %v81_v11 = vld [vmem:[%s2156_s0 + $0x10] sm:$0xff]  ;;  %v82_v12 = vld [vmem:[%s2156_s0 + $0x18] sm:$0xff]  ;;  %1486 = vmatprep.mubr.msk.bf16.mxu1 %vm1759_vm3, %v1757_v1  ;;  %v1760_v15 = vmov 0   ;;  %v83_v17 = vld [vmem:[%s2156_s0 + $0x20] sm:$0xff] }
  0x12   :  { %1484 = vmatprep.subr.bf16.mxu1 %v1757_v1  ;;  %v111_v9 = vsel %vm109_vm1, %v110_v4, 0  ;;  %v88_v14 = vpack.c.bf16 %v82_v12, %v81_v11  ;;  %v1846_v16 = vld [vmem:[%s2158_s2 + $0x18] sm:$0xff]   ;;  %v84_v18 = vld [vmem:[%s2156_s0 + $0x28] sm:$0xff]  ;;  %v85_v20 = vld [vmem:[%s2156_s0 + $0x30] sm:$0xff]  ;;  %vm192_vm4 = vcmask 261120   ;;  %vm268_vm5 = vcmask 523264  }
  0x13   :  { %v113_v13 = vand.u32 %v111_v9, %v40_v2  ;;  %1474 = vmatprep.mubr.msk.bf16.mxu0 %vm95_vm2, %v87_v10  ;;  %v89_v19 = vpack.c.bf16 %v84_v18, %v83_v17  ;;  %v86_v21 = vld [vmem:[%s2156_s0 + $0x38] sm:$0xff]  ;;  %v1865_v22 = vld [vmem:[%s2158_s2 + $0x20] sm:$0xff]   ;;  %v1874_v24 = vld [vmem:[%s2158_s2 + $0x28] sm:$0xff]   ;;  %s1761_s9 = smov 32   ;;  %vm995_vm6 = vcmask 1043456   ;;  %vm991_vm7 = vcmask 56320  }
  0x14   :  { %v90_v23 = vpack.c.bf16 %v86_v21, %v85_v20  ;;  %v1883_v25 = vld [vmem:[%s2158_s2 + $0x30] sm:$0xff]   ;;  %v1890_v27 = vld [vmem:[%s2160_s4] ss:$0 sm:$0xff]  ;;  %v1928_v46 = vld [vmem:[%s2160_s4 + $0x1] ss:$0 sm:$0xff]  ;;  %vm1108_vm8 = vcmask 130048  }
  0x15   :  { %1485 = vmatpush3.bf16.msra.mxu1 %v1816_v6  ;;  %1472 = vmatprep.subr.bf16.mxu0 %v113_v13  ;;  %s37_s12 = sld [smem:[#allocation2]]  ;;  %s1339_s15 = sld [smem:[#allocation2 + $0x2]]  ;;  %vm1331_vm9 = vcmask 7168  }
  0x16   :  { %1502 = vmatprep.subr.bf16.mxu1 %v1757_v1  ;;  %1473 = vmatpush3.bf16.msra.mxu0 %v113_v13 }
  0x17   :  { %1490 = vmatprep.subr.bf16.mxu0 %v1757_v1 }
  0x18   :  { %1487 = vmatmul.mubr.bf16.vlgmr.msra.gmra.mrb[0].mxu1 %v1760_v15 }
  0x19   :  { %1503 = vmatpush3.bf16.msra.mxu1 %v1803_v0  ;;  %1506 = vmatprep.mubr.msk.bf16.mxu1 %vm1759_vm3, %v1757_v1 }
  0x1a   :  { %1475 = vmatmul.mubr.msk.bf16.vlgmr.msra.gmra.mrb[0].mxu0 %vm95_vm2, %v88_v14  ;;  %1504 = vmatprep.subr.bf16.mxu1 %v1757_v1 }
  0x1b   :  { %1491 = vmatpush3.bf16.msra.mxu0 %v1846_v16  ;;  %1478 = vmatprep.mubr.msk.bf16.mxu0 %vm95_vm2, %v89_v19 }
  0x1c   :  { %1492 = vmatprep.subr.bf16.mxu0 %v1757_v1 }
  0x1d   :  { %1505 = vmatpush3.bf16.msra.mxu1 %v1816_v6 }
  0x1e   :  { %1510 = vmatprep.subr.bf16.mxu1 %v1757_v1 }
  0x1f   :  { %1493 = vmatpush3.bf16.msra.mxu0 %v1865_v22 }
  0x20   :  { %1494 = vmatprep.subr.bf16.mxu0 %v1757_v1 }
  0x22   :  { %1479 = vmatmul.mubr.msk.bf16.gmra.mrb[4].mxu0 %vm95_vm2, %v90_v23 }
  0x23   :  { %1498 = vmatprep.mubr.msk.bf16.mxu0 %vm1759_vm3, %v1757_v1  ;;  %1495 = vmatpush3.bf16.msra.mxu0 %v1874_v24 }
  0x24   :  { %1496 = vmatprep.subr.bf16.mxu0 %v1757_v1 }
  0x27   :  { %1497 = vmatpush3.bf16.msra.mxu0 %v1883_v25 }
  0x28   :  { %1522 = vmatprep.subr.bf16.mxu0 %v1757_v1 }
  0xeb   :  { %v230_v26 = vpop.f32.mrb[0].mxu1 }
  0xec   :  { %v1488_v28 = vpop.f32.mrb[1].mxu1 }
  0xed   :  { %v1892_v29 = vpop.f32.mrb[0].mxu0  ;;  %v233_v30 = vpop.f32.mrb[2].mxu1 }
  0xee   :  { %v149_v31 = vpop.f32.mrb[1].mxu0  ;;  %v1489_v32 = vpop.f32.mrb[3].mxu1  ;;  %v158_v63 = vadd.f32 %v1892_v29, %v1890_v27 }
  0xef   :  { %v150_v33 = vadd.f32 %v1890_v27, %v149_v31  ;;  %v1895_v34 = vpop.f32.mrb[2].mxu0 }
  0xf0   :  { %v152_v35 = vpop.f32.mrb[3].mxu0  ;;  %v161_v18 = vadd.f32 %v1895_v34, %v1890_v27 }
  0xf1   :  { %v236_v36 = vadd.f32 %v230_v26, %v150_v33  ;;  %v153_v45 = vadd.f32 %v1890_v27, %v152_v35 }
  0xf3   :  { %1700 = vtanh.f32 %v236_v36 }
  0xf5   :  { %v1916_v41 = vpop.f32.mrb[4].mxu0 }
  0xf6   :  { %v1918_v42 = vpop.f32.mrb[5].mxu0 }
  0xf7   :  { %v1920_v43 = vpop.f32.mrb[6].mxu0 }
  0xf8   :  { %v1922_v44 = vpop.f32.mrb[7].mxu0 }
  0xfd   :  { %v1701_v37 = vpop.eup %1700 }
  0xfe   :  { %v238_v38 = vsel %vm192_vm4, %v1701_v37, 0.0  ;;  %v313_v39 = vpack.c.bf16 %v1701_v37, %v1701_v37 }
  0xff   :  { %v239_v40 = vpack.c.bf16 %v238_v38, %v238_v38  ;;  %v166_v38 = vadd.f32 %v1890_v27, %v1918_v42 }
 0x100   :  { %1507 = vmatmul.mubr.msk.bf16.vlgmr.msra.gmra.mrb[4].mxu1 %vm192_vm4, %v313_v39 }
 0x101   :  { %1499 = vmatmul.mubr.msk.bf16.vlgmr.msra.gmra.mrb[8].mxu0 %vm268_vm5, %v239_v40  ;;  %1511 = vmatpush3.bf16.msra.mxu1 %v1846_v16 }
 0x102   :  { %1523 = vmatpush3.bf16.msra.mxu0 %v1803_v0  ;;  %1526 = vmatprep.mubr.msk.bf16.mxu0 %vm1759_vm3, %v1757_v1 }
 0x103   :  { %1524 = vmatprep.subr.bf16.mxu0 %v1757_v1  ;;  %1512 = vmatprep.subr.bf16.mxu1 %v1757_v1 }
 0x104   :  { %1518 = vmatprep.mubr.msk.bf16.mxu1 %vm1759_vm3, %v1757_v1 }
 0x105   :  { %1513 = vmatpush3.bf16.msra.mxu1 %v1865_v22 }
 0x106   :  { %1525 = vmatpush3.bf16.msra.mxu0 %v1816_v6  ;;  %1514 = vmatprep.subr.bf16.mxu1 %v1757_v1 }
 0x107   :  { %1530 = vmatprep.subr.bf16.mxu0 %v1757_v1 }
 0x109   :  { %1515 = vmatpush3.bf16.msra.mxu1 %v1874_v24 }
 0x10a   :  { %1516 = vmatprep.subr.bf16.mxu1 %v1757_v1 }
 0x10d   :  { %1517 = vmatpush3.bf16.msra.mxu1 %v1883_v25 }
 0x10e   :  { %1542 = vmatprep.subr.bf16.mxu1 %v1757_v1 }
 0x1d3   :  { %v351_v47 = vpop.f32.mrb[4].mxu1 }
 0x1d4   :  { %v357_v48 = vadd.f32 %v351_v47, %v153_v45  ;;  %v306_v49 = vpop.f32.mrb[8].mxu0  ;;  %v1508_v50 = vpop.f32.mrb[5].mxu1 }
 0x1d5   :  { %v307_v51 = vadd.f32 %v1928_v46, %v306_v49  ;;  %v1500_v52 = vpop.f32.mrb[9].mxu0  ;;  %v354_v53 = vpop.f32.mrb[6].mxu1 }
 0x1d6   :  { %1702 = vtanh.f32 %v357_v48  ;;  %v309_v54 = vpop.f32.mrb[10].mxu0  ;;  %v1509_v55 = vpop.f32.mrb[7].mxu1 }
 0x1d7   :  { %1704 = vtanh.f32 %v307_v51  ;;  %v1501_v56 = vpop.f32.mrb[11].mxu0 }
 0x1e0   :  { %v1703_v57 = vpop.eup %1702 }
 0x1e1   :  { %v1705_v58 = vpop.eup %1704  ;;  %v409_v59 = vpack.c.bf16 %v1703_v57, %v1703_v57 }
 0x1e2   :  { %360 = vrot.lane.b32.xlu0 %v1705_v58, %s1761_s9 }
 0x1e3   :  { %1527 = vmatmul.mubr.msk.bf16.vlgmr.msra.gmra.mrb[12].mxu0 %vm192_vm4, %v409_v59  ;;  %v169_v59 = vadd.f32 %v1890_v27, %v1922_v44 }
 0x1e4   :  { %1531 = vmatpush3.bf16.msra.mxu0 %v1846_v16  ;;  %1538 = vmatprep.mubr.msk.bf16.mxu0 %vm1759_vm3, %v1757_v1 }
 0x1e5   :  { %1532 = vmatprep.subr.bf16.mxu0 %v1757_v1 }
 0x1e8   :  { %1533 = vmatpush3.bf16.msra.mxu0 %v1865_v22 }
 0x1e9   :  { %1534 = vmatprep.subr.bf16.mxu0 %v1757_v1 }
 0x1ec   :  { %1535 = vmatpush3.bf16.msra.mxu0 %v1874_v24 }
 0x1ed   :  { %1536 = vmatprep.subr.bf16.mxu0 %v1757_v1 }
 0x1f0   :  { %1537 = vmatpush3.bf16.msra.mxu0 %v1883_v25 }
 0x1f1   :  { %1562 = vmatprep.subr.bf16.mxu0 %v1757_v1 }
 0x254   :  { %v361_v60 = vpop.permute.xlu0 %360 }
 0x255   :  { %v363_v61 = vsel %vm192_vm4, %v1703_v57, %v361_v60 }
 0x256   :  { %v364_v62 = vpack.c.bf16 %v363_v61, %v363_v61 }
 0x258   :  { %1519 = vmatmul.mubr.msk.bf16.vlgmr.msra.gmra.mrb[8].mxu1 %vm268_vm5, %v364_v62 }
 0x259   :  { %1543 = vmatpush3.bf16.msra.mxu1 %v1803_v0  ;;  %1546 = vmatprep.mubr.msk.bf16.mxu1 %vm1759_vm3, %v1757_v1 }
 0x25a   :  { %1544 = vmatprep.subr.bf16.mxu1 %v1757_v1 }
 0x25d   :  { %1545 = vmatpush3.bf16.msra.mxu1 %v1816_v6 }
 0x25e   :  { %1550 = vmatprep.subr.bf16.mxu1 %v1757_v1 }
 0x2b6   :  { %v447_v2 = vpop.f32.mrb[12].mxu0 }
 0x2b7   :  { %v453_v3 = vadd.f32 %v447_v2, %v158_v63  ;;  %v1528_v4 = vpop.f32.mrb[13].mxu0 }
 0x2b8   :  { %v450_v7 = vpop.f32.mrb[14].mxu0 }
 0x2b9   :  { %1706 = vtanh.f32 %v453_v3  ;;  %v1529_v8 = vpop.f32.mrb[15].mxu0 }
 0x2c3   :  { %v1707_v9 = vpop.eup %1706 }
 0x2c4   :  { %v505_v10 = vpack.c.bf16 %v1707_v9, %v1707_v9 }
 0x2c6   :  { %1547 = vmatmul.mubr.msk.bf16.vlgmr.msra.gmra.mrb[12].mxu1 %vm192_vm4, %v505_v10 }
 0x2c7   :  { %1551 = vmatpush3.bf16.msra.mxu1 %v1846_v16  ;;  %1558 = vmatprep.mubr.msk.bf16.mxu1 %vm1759_vm3, %v1757_v1 }
 0x2c8   :  { %1552 = vmatprep.subr.bf16.mxu1 %v1757_v1 }
 0x2cb   :  { %1553 = vmatpush3.bf16.msra.mxu1 %v1865_v22 }
 0x2cc   :  { %1554 = vmatprep.subr.bf16.mxu1 %v1757_v1 }
 0x2cf   :  { %1555 = vmatpush3.bf16.msra.mxu1 %v1874_v24 }
 0x2d0   :  { %1556 = vmatprep.subr.bf16.mxu1 %v1757_v1 }
 0x2d3   :  { %1557 = vmatpush3.bf16.msra.mxu1 %v1883_v25 }
 0x2d4   :  { %1582 = vmatprep.subr.bf16.mxu1 %v1757_v1 }
 0x32b   :  { %v402_v11 = vpop.f32.mrb[8].mxu1 }
 0x32c   :  { %v403_v12 = vadd.f32 %v1928_v46, %v402_v11  ;;  %v1520_v13 = vpop.f32.mrb[9].mxu1 }
 0x32d   :  { %v405_v14 = vpop.f32.mrb[10].mxu1 }
 0x32e   :  { %1708 = vtanh.f32 %v403_v12  ;;  %v1521_v15 = vpop.f32.mrb[11].mxu1 }
 0x32f   :  { %v174_v15 = vadd.f32 %v1916_v41, %v1890_v27 }
 0x338   :  { %v1709_v17 = vpop.eup %1708 }
 0x339   :  { %456 = vrot.lane.b32.xlu0 %v1709_v17, %s1761_s9 }
 0x399   :  { %v543_v19 = vpop.f32.mrb[12].mxu1 }
 0x39a   :  { %v549_v20 = vadd.f32 %v543_v19, %v161_v18  ;;  %v1548_v21 = vpop.f32.mrb[13].mxu1 }
 0x39b   :  { %v546_v23 = vpop.f32.mrb[14].mxu1 }
 0x39c   :  { %v1549_v26 = vpop.f32.mrb[15].mxu1  ;;  %1710 = vtanh.f32 %v549_v20 }
 0x3a6   :  { %v1711_v31 = vpop.eup %1710 }
 0x3a7   :  { %v601_v32 = vpack.c.bf16 %v1711_v31, %v1711_v31 }
 0x3ab   :  { %v457_v28 = vpop.permute.xlu0 %456 }
 0x3ac   :  { %v459_v29 = vsel %vm192_vm4, %v1707_v9, %v457_v28 }
 0x3ad   :  { %v460_v30 = vpack.c.bf16 %v459_v29, %v459_v29 }
 0x3af   :  { %1539 = vmatmul.mubr.msk.bf16.vlgmr.msra.gmra.mrb[16].mxu0 %vm268_vm5, %v460_v30 }
 0x3b0   :  { %1563 = vmatpush3.bf16.msra.mxu0 %v1803_v0  ;;  %1566 = vmatprep.mubr.msk.bf16.mxu0 %vm1759_vm3, %v1757_v1 }
 0x3b1   :  { %1564 = vmatprep.subr.bf16.mxu0 %v1757_v1 }
 0x3b4   :  { %1565 = vmatpush3.bf16.msra.mxu0 %v1816_v6 }
 0x3b5   :  { %1570 = vmatprep.subr.bf16.mxu0 %v1757_v1 }
 0x3b7   :  { %1567 = vmatmul.mubr.msk.bf16.vlgmr.msra.gmra.mrb[20].mxu0 %vm192_vm4, %v601_v32 }
 0x3b8   :  { %1571 = vmatpush3.bf16.msra.mxu0 %v1846_v16  ;;  %1578 = vmatprep.mubr.msk.bf16.mxu0 %vm1759_vm3, %v1757_v1 }
 0x3b9   :  { %1572 = vmatprep.subr.bf16.mxu0 %v1757_v1 }
 0x3bc   :  { %1573 = vmatpush3.bf16.msra.mxu0 %v1865_v22 }
 0x3bd   :  { %1574 = vmatprep.subr.bf16.mxu0 %v1757_v1 }
 0x3c0   :  { %1575 = vmatpush3.bf16.msra.mxu0 %v1874_v24 }
 0x3c1   :  { %1576 = vmatprep.subr.bf16.mxu0 %v1757_v1 }
 0x3c4   :  { %1577 = vmatpush3.bf16.msra.mxu0 %v1883_v25 }
 0x3c5   :  { %1602 = vmatprep.subr.bf16.mxu0 %v1757_v1 }
 0x482   :  { %v498_v33 = vpop.f32.mrb[16].mxu0 }
 0x483   :  { %v499_v34 = vadd.f32 %v1928_v46, %v498_v33  ;;  %v1540_v35 = vpop.f32.mrb[17].mxu0 }
 0x484   :  { %v501_v36 = vpop.f32.mrb[18].mxu0 }
 0x485   :  { %1712 = vtanh.f32 %v499_v34  ;;  %v1541_v37 = vpop.f32.mrb[19].mxu0 }
 0x48a   :  { %v639_v39 = vpop.f32.mrb[20].mxu0 }
 0x48b   :  { %v645_v40 = vadd.f32 %v639_v39, %v166_v38  ;;  %v1568_v45 = vpop.f32.mrb[21].mxu0  ;;  %v997_v38 = vsel %vm995_vm6, %v1810_v5, 0 }
 0x48c   :  { %v642_v47 = vpop.f32.mrb[22].mxu0 }
 0x48d   :  { %v1569_v48 = vpop.f32.mrb[23].mxu0  ;;  %1714 = vtanh.f32 %v645_v40 }
 0x48f   :  { %v1713_v49 = vpop.eup %1712 }
 0x490   :  { %552 = vrot.lane.b32.xlu1 %v1713_v49, %s1761_s9 }
 0x497   :  { %v1715_v42 = vpop.eup %1714 }
 0x498   :  { %v697_v53 = vpack.c.bf16 %v1715_v42, %v1715_v42 }
 0x502   :  { %v553_v50 = vpop.permute.xlu1 %552 }
 0x503   :  { %v555_v51 = vsel %vm192_vm4, %v1711_v31, %v553_v50  ;;  %v985_v50 = vld [vmem:[%s2157_s1] sm:$0xff] }
 0x504   :  { %v556_v52 = vpack.c.bf16 %v555_v51, %v555_v51  ;;  %v986_v51 = vpack.c.bf16 %v985_v50, %v985_v50 }
 0x506   :  { %1559 = vmatmul.mubr.msk.bf16.vlgmr.msra.gmra.mrb[16].mxu1 %vm268_vm5, %v556_v52 }
 0x507   :  { %1583 = vmatpush3.bf16.msra.mxu1 %v1803_v0  ;;  %1586 = vmatprep.mubr.msk.bf16.mxu1 %vm1759_vm3, %v1757_v1 }
 0x508   :  { %1584 = vmatprep.subr.bf16.mxu1 %v1757_v1 }
 0x50b   :  { %1585 = vmatpush3.bf16.msra.mxu1 %v1816_v6 }
 0x50c   :  { %1590 = vmatprep.subr.bf16.mxu1 %v1757_v1 }
 0x50e   :  { %1587 = vmatmul.mubr.msk.bf16.vlgmr.msra.gmra.mrb[20].mxu1 %vm192_vm4, %v697_v53 }
 0x50f   :  { %1591 = vmatpush3.bf16.msra.mxu1 %v1846_v16  ;;  %1598 = vmatprep.mubr.msk.bf16.mxu1 %vm1759_vm3, %v1757_v1 }
 0x510   :  { %1592 = vmatprep.subr.bf16.mxu1 %v1757_v1 }
 0x513   :  { %1593 = vmatpush3.bf16.msra.mxu1 %v1865_v22 }
 0x514   :  { %1594 = vmatprep.subr.bf16.mxu1 %v1757_v1 }
 0x517   :  { %1595 = vmatpush3.bf16.msra.mxu1 %v1874_v24 }
 0x518   :  { %1596 = vmatprep.subr.bf16.mxu1 %v1757_v1 }
 0x51b   :  { %1597 = vmatpush3.bf16.msra.mxu1 %v1883_v25 }
 0x51c   :  { %1622 = vmatprep.subr.bf16.mxu1 %v1757_v1 }
 0x5d9   :  { %v594_v54 = vpop.f32.mrb[16].mxu1 }
 0x5da   :  { %v595_v55 = vadd.f32 %v1928_v46, %v594_v54  ;;  %v1560_v56 = vpop.f32.mrb[17].mxu1 }
 0x5db   :  { %v597_v57 = vpop.f32.mrb[18].mxu1  ;;  %v1367_v56 = vld [vmem:[%s2160_s4 + $0x2] ss:$0 sm:$0xff] }
 0x5dc   :  { %1716 = vtanh.f32 %v595_v55  ;;  %v1561_v58 = vpop.f32.mrb[19].mxu1 }
 0x5dd   :  { %v1692_v58 = vld [vmem:[%s2159_s3 + $0x10] sm:$0xff]  }
 0x5e1   :  { %v735_v60 = vpop.f32.mrb[20].mxu1 }
 0x5e2   :  { %v741_v61 = vadd.f32 %v735_v60, %v169_v59  ;;  %v1588_v62 = vpop.f32.mrb[21].mxu1  ;;  %v1693_v59 = vld [vmem:[%s2159_s3] sm:$0xff]  }
 0x5e3   :  { %v738_v63 = vpop.f32.mrb[22].mxu1 }
 0x5e4   :  { %v1589_v2 = vpop.f32.mrb[23].mxu1  ;;  %1718 = vtanh.f32 %v741_v61  ;;  %v1694_v63 = vld [vmem:[%s2159_s3 + $0x18] sm:$0xff]  }
 0x5e5   :  { %v1695_v2 = vld [vmem:[%s2159_s3 + $0x8] sm:$0xff]  }
 0x5e6   :  { %v1717_v3 = vpop.eup %1716 }
 0x5e7   :  { %648 = vrot.lane.b32.xlu1 %v1717_v3, %s1761_s9 }
 0x5ee   :  { %v1719_v44 = vpop.eup %1718 }
 0x5ef   :  { %v793_v9 = vpack.c.bf16 %v1719_v44, %v1719_v44 }
 0x659   :  { %v649_v4 = vpop.permute.xlu1 %648 }
 0x65a   :  { %v651_v7 = vsel %vm192_vm4, %v1715_v42, %v649_v4 }
 0x65b   :  { %v652_v8 = vpack.c.bf16 %v651_v7, %v651_v7 }
 0x65d   :  { %1579 = vmatmul.mubr.msk.bf16.vlgmr.msra.gmra.mrb[24].mxu0 %vm268_vm5, %v652_v8 }
 0x65e   :  { %1603 = vmatpush3.bf16.msra.mxu0 %v1803_v0  ;;  %1606 = vmatprep.mubr.msk.bf16.mxu0 %vm1759_vm3, %v1757_v1 }
 0x65f   :  { %1604 = vmatprep.subr.bf16.mxu0 %v1757_v1 }
 0x662   :  { %1605 = vmatpush3.bf16.msra.mxu0 %v1816_v6 }
 0x663   :  { %1610 = vmatprep.subr.bf16.mxu0 %v1757_v1 }
 0x665   :  { %1607 = vmatmul.mubr.msk.bf16.vlgmr.msra.gmra.mrb[28].mxu0 %vm192_vm4, %v793_v9 }
 0x666   :  { %1611 = vmatpush3.bf16.msra.mxu0 %v1846_v16  ;;  %1618 = vmatprep.mubr.msk.bf16.mxu0 %vm1759_vm3, %v1757_v1 }
 0x667   :  { %1612 = vmatprep.subr.bf16.mxu0 %v1757_v1 }
 0x66a   :  { %1613 = vmatpush3.bf16.msra.mxu0 %v1865_v22 }
 0x66b   :  { %1614 = vmatprep.subr.bf16.mxu0 %v1757_v1 }
 0x66e   :  { %1615 = vmatpush3.bf16.msra.mxu0 %v1874_v24 }
 0x66f   :  { %1616 = vmatprep.subr.bf16.mxu0 %v1757_v1 }
 0x672   :  { %1617 = vmatpush3.bf16.msra.mxu0 %v1883_v25 }
 0x673   :  { %1642 = vmatprep.subr.bf16.mxu0 %v1757_v1 }
 0x730   :  { %v690_v10 = vpop.f32.mrb[24].mxu0 }
 0x731   :  { %v691_v11 = vadd.f32 %v1928_v46, %v690_v10  ;;  %v1580_v12 = vpop.f32.mrb[25].mxu0 }
 0x732   :  { %v693_v13 = vpop.f32.mrb[26].mxu0 }
 0x733   :  { %1720 = vtanh.f32 %v691_v11  ;;  %v1581_v14 = vpop.f32.mrb[27].mxu0 }
 0x734   :  { %v1375_v14 = vld [vmem:[%s2160_s4 + $0x5] ss:$0 sm:$0xff] }
 0x738   :  { %v831_v17 = vpop.f32.mrb[28].mxu0 }
 0x739   :  { %v837_v18 = vadd.f32 %v831_v17, %v174_v15  ;;  %v1608_v19 = vpop.f32.mrb[29].mxu0 }
 0x73a   :  { %v834_v20 = vpop.f32.mrb[30].mxu0 }
 0x73b   :  { %v1609_v21 = vpop.f32.mrb[31].mxu0  ;;  %1722 = vtanh.f32 %v837_v18 }
 0x73c   :  { %v1379_v21 = vld [vmem:[%s2160_s4 + $0x6] ss:$0 sm:$0xff] }
 0x73d   :  { %v1721_v23 = vpop.eup %1720 }
 0x73e   :  { %744 = vrot.lane.b32.xlu0 %v1721_v23, %s1761_s9 }
 0x745   :  { %v1723_v41 = vpop.eup %1722 }
 0x746   :  { %v889_v30 = vpack.c.bf16 %v1723_v41, %v1723_v41 }
 0x7b0   :  { %v745_v26 = vpop.permute.xlu0 %744 }
 0x7b1   :  { %v747_v28 = vsel %vm192_vm4, %v1719_v44, %v745_v26 }
 0x7b2   :  { %v748_v29 = vpack.c.bf16 %v747_v28, %v747_v28  ;;  %v1369_v28 = vld [vmem:[%s2160_s4 + $0x3] ss:$0 sm:$0xff] }
 0x7b4   :  { %1599 = vmatmul.mubr.msk.bf16.vlgmr.msra.gmra.mrb[24].mxu1 %vm268_vm5, %v748_v29 }
 0x7b5   :  { %1623 = vmatpush3.bf16.msra.mxu1 %v1803_v0  ;;  %1626 = vmatprep.mubr.msk.bf16.mxu1 %vm1759_vm3, %v1757_v1 }
 0x7b6   :  { %1624 = vmatprep.subr.bf16.mxu1 %v1757_v1 }
 0x7b9   :  { %1625 = vmatpush3.bf16.msra.mxu1 %v1816_v6 }
 0x7ba   :  { %1630 = vmatprep.subr.bf16.mxu1 %v1757_v1 }
 0x7bc   :  { %1627 = vmatmul.mubr.msk.bf16.vlgmr.msra.gmra.mrb[28].mxu1 %vm192_vm4, %v889_v30 }
 0x7bd   :  { %1631 = vmatpush3.bf16.msra.mxu1 %v1846_v16  ;;  %1638 = vmatprep.mubr.msk.bf16.mxu1 %vm1759_vm3, %v1757_v1 }
 0x7be   :  { %1632 = vmatprep.subr.bf16.mxu1 %v1757_v1 }
 0x7c1   :  { %1633 = vmatpush3.bf16.msra.mxu1 %v1865_v22  ;;  %v177_v22 = vadd.f32 %v1920_v43, %v1890_v27 }
 0x7c2   :  { %1634 = vmatprep.subr.bf16.mxu1 %v1757_v1 }
 0x7c5   :  { %1635 = vmatpush3.bf16.msra.mxu1 %v1874_v24 }
 0x7c6   :  { %1636 = vmatprep.subr.bf16.mxu1 %v1757_v1 }
 0x7c9   :  { %1637 = vmatpush3.bf16.msra.mxu1 %v1883_v25  ;;  %v53_v25 = vld [vmem:[%s2158_s2 + $0x38] sm:$0xf]  ;;  %s1338_s2 = sld [smem:[#allocation2 + $0x1]] }
 0x7ca   :  { %1656 = vmatprep.subr.bf16.mxu1 %v1757_v1  ;;  %v999_v40 = vand.u32 %v997_v38, %v53_v25 }
 0x887   :  { %v786_v0 = vpop.f32.mrb[24].mxu1 }
 0x888   :  { %v787_v6 = vadd.f32 %v1928_v46, %v786_v0  ;;  %v1600_v16 = vpop.f32.mrb[25].mxu1 }
 0x889   :  { %v789_v31 = vpop.f32.mrb[26].mxu1 }
 0x88a   :  { %1724 = vtanh.f32 %v787_v6  ;;  %v1601_v32 = vpop.f32.mrb[27].mxu1  ;;  %v1373_v6 = vld [vmem:[%s2160_s4 + $0x4] ss:$0 sm:$0xff] }
 0x88f   :  { %v927_v33 = vpop.f32.mrb[28].mxu1 }
 0x890   :  { %v933_v34 = vadd.f32 %v927_v33, %v177_v22  ;;  %v1628_v35 = vpop.f32.mrb[29].mxu1  ;;  %v1696_v33 = vld [vmem:[%s2159_s3 + $0x30] sm:$0xff]  }
 0x891   :  { %v930_v24 = vpop.f32.mrb[30].mxu1  ;;  %v1698_v35 = vld [vmem:[%s2159_s3 + $0x38] sm:$0xff]  }
 0x892   :  { %v1629_v36 = vpop.f32.mrb[31].mxu1  ;;  %v1699_v24 = vld [vmem:[%s2159_s3 + $0x28] sm:$0xff]  }
 0x894   :  { %v1725_v37 = vpop.eup %1724 }
 0x895   :  { %840 = vrot.lane.b32.xlu1 %v1725_v37, %s1761_s9  ;;  %v1189_v37 = vstv %s1338_s2 }
 0x907   :  { %v841_v39 = vpop.permute.xlu1 %840 }
 0x908   :  { %v843_v45 = vsel %vm192_vm4, %v1723_v41, %v841_v39  ;;  %v1112_v39 = vstv %s37_s12 }
 0x909   :  { %v844_v27 = vpack.c.bf16 %v843_v45, %v843_v45 }
 0x90b   :  { %1619 = vmatmul.mubr.msk.bf16.vlgmr.msra.gmra.mrb[32].mxu0 %vm268_vm5, %v844_v27 }
 0x90c   :  { %1643 = vmatpush3.bf16.msra.mxu0 %v999_v40  ;;  %1644 = vmatprep.mubr.msk.bf16.mxu0 %vm1759_vm3, %v1757_v1 }
 0x90d   :  { %1648 = vmatprep.subr.bf16.mxu0 %v1757_v1 }
 0x913   :  { %1645 = vmatmul.mubr.msk.bf16.vlgmr.msra.gmra.mrb[36].mxu0 %vm991_vm7, %v986_v51 }
 0x914   :  { %1652 = vmatprep.mubr.msk.bf16.mxu0 %vm1759_vm3, %v1757_v1  ;;  %1649 = vmatpush3.bf16.msra.mxu0 %v1693_v59 }
 0x915   :  { %1650 = vmatprep.subr.bf16.mxu0 %v1757_v1 }
 0x918   :  { %1651 = vmatpush3.bf16.msra.mxu0 %v1695_v2 }
 0x919   :  { %1664 = vmatprep.subr.bf16.mxu0 %v1757_v1 }
 0x9de   :  { %v882_v43 = vpop.f32.mrb[32].mxu0 }
 0x9df   :  { %v883_v47 = vadd.f32 %v1928_v46, %v882_v43  ;;  %v1620_v48 = vpop.f32.mrb[33].mxu0 }
 0x9e0   :  { %v885_v49 = vpop.f32.mrb[34].mxu0 }
 0x9e1   :  { %1726 = vtanh.f32 %v883_v47  ;;  %v1621_v5 = vpop.f32.mrb[35].mxu0 }
 0x9e2   :  { %1728 = vtanh.f32 %v933_v34  ;;  %v1697_v34 = vld [vmem:[%s2159_s3 + $0x20] sm:$0xff]  }
 0x9e6   :  { %v1035_v57 = vpop.f32.mrb[36].mxu0 }
 0x9e7   :  { %v1036_v60 = vadd.f32 %v1367_v56, %v1035_v57  ;;  %v1646_v61 = vpop.f32.mrb[37].mxu0 }
 0x9e8   :  { %v1038_v62 = vpop.f32.mrb[38].mxu0 }
 0x9e9   :  { %v2095_v3 = vmax.f32 %v1036_v60, 0.0  ;;  %v1647_v4 = vpop.f32.mrb[39].mxu0 }
 0x9eb   :  { %v1727_v52 = vpop.eup %1726  ;;  %v1120_v7 = vpack.c.bf16 %v2095_v3, %v2095_v3 }
 0x9ec   :  { %936 = vrot.lane.b32.xlu0 %v1727_v52, %s1761_s9  ;;  %v1729_v42 = vpop.eup %1728 }
 0xa5e   :  { %v937_v53 = vpop.permute.xlu0 %936 }
 0xa5f   :  { %v939_v54 = vsel %vm192_vm4, %v1729_v42, %v937_v53 }
 0xa60   :  { %v940_v55 = vpack.c.bf16 %v939_v54, %v939_v54 }
 0xa62   :  { %1639 = vmatmul.mubr.msk.bf16.vlgmr.msra.gmra.mrb[32].mxu1 %vm268_vm5, %v940_v55 }
 0xa63   :  { %1660 = vmatprep.mubr.msk.bf16.mxu1 %vm1759_vm3, %v1757_v1  ;;  %1657 = vmatpush3.bf16.msra.mxu1 %v1692_v58  ;;  %v1387_v58 = vld [vmem:[%s2160_s4 + $0x7] ss:$0 sm:$0xff] }
 0xa64   :  { %1658 = vmatprep.subr.bf16.mxu1 %v1757_v1 }
 0xa67   :  { %1659 = vmatpush3.bf16.msra.mxu1 %v1694_v63 }
 0xa68   :  { %1672 = vmatprep.subr.bf16.mxu1 %v1757_v1 }
 0xa6a   :  { %1661 = vmatmul.mubr.msk.bf16.vlgmr.msra.gmra.mrb[36].mxu1 %vm192_vm4, %v1120_v7 }
 0xa6b   :  { %1676 = vmatprep.mubr.msk.bf16.mxu1 %vm1759_vm3, %v1757_v1  ;;  %1673 = vmatpush3.bf16.msra.mxu1 %v1697_v34 }
 0xa6c   :  { %1674 = vmatprep.subr.bf16.mxu1 %v1757_v1 }
 0xa6f   :  { %1675 = vmatpush3.bf16.msra.mxu1 %v1699_v24 }
 0xb35   :  { %v978_v8 = vpop.f32.mrb[32].mxu1 }
 0xb36   :  { %v979_v44 = vadd.f32 %v1928_v46, %v978_v8  ;;  %v1640_v9 = vpop.f32.mrb[33].mxu1  ;;  %v1388_v8 = vld [vmem:[%s2160_s4 + $0x8] ss:$0 sm:$0xff] }
 0xb37   :  { %v981_v10 = vpop.f32.mrb[34].mxu1 }
 0xb38   :  { %1730 = vtanh.f32 %v979_v44  ;;  %v1641_v11 = vpop.f32.mrb[35].mxu1 }
 0xb39   :  { %v1329_v11 = vstv %s1339_s15 }
 0xb3d   :  { %v1174_v15 = vpop.f32.mrb[36].mxu1 }
 0xb3e   :  { %v1175_v46 = vadd.f32 %v1375_v14, %v1174_v15  ;;  %v1662_v17 = vpop.f32.mrb[37].mxu1 }
 0xb3f   :  { %v1177_v18 = vpop.f32.mrb[38].mxu1 }
 0xb40   :  { %v1663_v19 = vpop.f32.mrb[39].mxu1  ;;  %v1180_v20 = vmax.f32 %v1175_v46, 0.0 }
 0xb42   :  { %v2107_v12 = vpop.eup %1730  ;;  %v1185_v23 = vmul.f32 %v1379_v21, %v1180_v20 }
 0xb43   :  { %v1042_v13 = vpack.c.bf16 %v2107_v12, %v2107_v12 }
 0xb44   :  { %v1186_v26 = vsel %vm1108_vm8, %v1185_v23, 0.0 }
 0xb45   :  { %1653 = vmatmul.mubr.msk.bf16.vlgmr.msra.gmra.mrb[40].mxu0 %vm192_vm4, %v1042_v13  ;;  %1187 = vadd.xlane.f32.xlu0 %v1186_v26 }
 0xb46   :  { %1668 = vmatprep.mubr.msk.bf16.mxu0 %vm1759_vm3, %v1757_v1  ;;  %1665 = vmatpush3.bf16.msra.mxu0 %v1696_v33 }
 0xb47   :  { %1666 = vmatprep.subr.bf16.mxu0 %v1757_v1 }
 0xb4a   :  { %1667 = vmatpush3.bf16.msra.mxu0 %v1698_v35 }
 0xbd2   :  { %v1188_v36 = vpop.xlane.xlu0 %1187 }
 0xbd3   :  { %v1190_v25 = vadd.f32 %v1189_v37, %v1188_v36 }
 0xbd5   :  { %v1380_v38 = vmul.f32 -1.442695, %v1190_v25 }
 0xbd7   :  { %1732 = vpow2.f32 %v1380_v38 }
 0xbe1   :  { %v1733_v43 = vpop.eup %1732 }
 0xbe2   :  { %v1194_v47 = vadd.f32 1.0, %v1733_v43 }
 0xc18   :  { %v1096_v29 = vpop.f32.mrb[40].mxu0 }
 0xc19   :  { %v1097_v41 = vadd.f32 %v1369_v28, %v1096_v29  ;;  %v1654_v30 = vpop.f32.mrb[41].mxu0 }
 0xc1a   :  { %v1099_v0 = vpop.f32.mrb[42].mxu0 }
 0xc1b   :  { %v1102_v16 = vmax.f32 %v1097_v41, 0.0  ;;  %v1655_v31 = vpop.f32.mrb[43].mxu0 }
 0xc1d   :  { %v1107_v32 = vmul.f32 %v1373_v6, %v1102_v16 }
 0xc1f   :  { %v1109_v22 = vsel %vm1108_vm8, %v1107_v32, 0.0 }
 0xc20   :  { %1110 = vadd.xlane.f32.xlu1 %v1109_v22 }
 0xcad   :  { %v1111_v40 = vpop.xlane.xlu1 %1110 }
 0xcae   :  { %v1113_v45 = vadd.f32 %v1112_v39, %v1111_v40 }
 0xcb0   :  { %v1374_v27 = vmul.f32 -1.442695, %v1113_v45 }
 0xcb2   :  { %1734 = vpow2.f32 %v1374_v27 }
 0xcb3   :  { %1736 = vrcp.f32 %v1194_v47 }
 0xcbc   :  { %v1735_v48 = vpop.eup %1734 }
 0xcbd   :  { %v1117_v49 = vadd.f32 1.0, %v1735_v48  ;;  %v1737_v1 = vpop.eup %1736 }
 0xcbf   :  { %1738 = vrcp.f32 %v1117_v49 }
 0xcc9   :  { %v1739_v5 = vpop.eup %1738 }
 0xcca   :  { %v1197_v50 = vadd.f32 %v1739_v5, %v1737_v1 }
 0xccc   :  { %1740 = vrcp.f32 %v1197_v50 }
 0xcd6   :  { %v1741_v51 = vpop.eup %1740 }
 0xcd7   :  { %v1200_v52 = vmul.f32 %v1741_v51, %v1737_v1  ;;  %v1199_v42 = vmul.f32 %v1741_v51, %v1739_v5 }
 0xcd9   :  { %v1203_v53 = vmul.f32 %v1200_v52, %v2095_v3  ;;  %v1201_v54 = vmul.f32 %v2107_v12, %v1199_v42 }
 0xcdb   :  { %v1204_v55 = vpack.c.bf16 %v1203_v53, %v1203_v53  ;;  %v1202_v56 = vpack.c.bf16 %v1201_v54, %v1201_v54 }
 0xcdd   :  { %1669 = vmatmul.mubr.msk.bf16.vlgmr.msra.gmra.mrb[44].mxu0 %vm192_vm4, %v1204_v55  ;;  %1677 = vmatmul.mubr.msk.bf16.vlgmr.msra.gmra.mrb[40].mxu1 %vm192_vm4, %v1202_v56 }
 0xdb0   :  { %v1254_v57 = vpop.f32.mrb[44].mxu0  ;;  %v1309_v59 = vpop.f32.mrb[40].mxu1 }
 0xdb1   :  { %v1310_v60 = vadd.f32 %v1309_v59, %v1254_v57  ;;  %v1670_v61 = vpop.f32.mrb[45].mxu0  ;;  %v1678_v62 = vpop.f32.mrb[41].mxu1 }
 0xdb2   :  { %v1257_v63 = vpop.f32.mrb[46].mxu0  ;;  %v1312_v2 = vpop.f32.mrb[42].mxu1 }
 0xdb3   :  { %v1319_v3 = vadd.f32 %v1387_v58, %v1310_v60  ;;  %v1671_v4 = vpop.f32.mrb[47].mxu0  ;;  %v1679_v7 = vpop.f32.mrb[43].mxu1 }
 0xdb5   :  { %v1320_v44 = vmax.f32 %v1319_v3, 0.0 }
 0xdb7   :  { %v1325_v9 = vmul.f32 %v1388_v8, %v1320_v44 }
 0xdb9   :  { %v1326_v10 = vsel %vm1108_vm8, %v1325_v9, 0.0 }
 0xdba   :  { %1327 = vadd.xlane.f32.xlu0 %v1326_v10 }
 0xe47   :  { %v1328_v12 = vpop.xlane.xlu0 %1327 }
 0xe48   :  { %v1330_v13 = vadd.f32 %v1329_v11, %v1328_v12 }
 0xe4a   :  { %1332 = vst.msk [vmem:[%s2162_s6] sm:$0xff] %vm1331_vm9, %v1330_v13 }
 0xe4b   :  { %1337 = vsyncpa [#allocation3], 1 }

</bundles_post_ra>
